<compile_context>
chip_gen: v7x
topology: tpu7x:2x2x1
jax: 0.10.0
libtpu: 0.0.40
codegen_flags: <defaults>
</compile_context>

<pallas_src>
import functools

import jax
import jax.numpy as jnp
from jax.experimental import pallas as pl
from jax.experimental.pallas import tpu as pltpu

_LANE = 128


def _ce_kernel(logits_ref, labels_ref, out_ref, m_sc, l_sc, pick_sc, *,
               total_b, total_c, mask_rows, mask_cols):
    bi = pl.program_id(0)
    ci = pl.program_id(1)
    tb, tc = logits_ref.shape

    @pl.when(ci == 0)
    def _init():
        m_sc[...] = jnp.full(m_sc.shape, -jnp.inf, dtype=jnp.float32)
        l_sc[...] = jnp.zeros(l_sc.shape, dtype=jnp.float32)
        pick_sc[...] = jnp.zeros(pick_sc.shape, dtype=jnp.float32)

    logits = logits_ref[...].astype(jnp.float32)     # (TB, TC); only cast, on VPU
    labels = labels_ref[...]                          # (TB, 1) int32

    # Class indices of this tile as a single lane row; broadcasting against the
    # (TB,1) labels avoids a full (TB,TC) int32 iota temporary.
    col = ci * tc + jax.lax.broadcasted_iota(jnp.int32, (1, tc), 1)   # (1, TC)

    # Padded class columns / batch rows may hold garbage (even inf/NaN); they
    # are removed with jnp.where *select* semantics.  Do not replace the
    # selects with multiplies -- that would reintroduce NaN propagation.
    if mask_cols:
        masked = jnp.where(col < total_c, logits, -jnp.inf)
    else:
        masked = logits

    # Online (flash-style) log-sum-exp across class tiles.
    m_prev = m_sc[...]
    m_new = jnp.maximum(m_prev, jnp.max(masked, axis=-1, keepdims=True))
    alpha = jnp.exp(m_prev - m_new)
    l_sc[...] = alpha * l_sc[...] + jnp.sum(jnp.exp(masked - m_new),
                                            axis=-1, keepdims=True)
    m_sc[...] = m_new

    # Ground-truth logit: exactly one class tile matches each (valid) label.
    pick_sc[...] += jnp.sum(jnp.where(col == labels, logits, 0.0),
                            axis=-1, keepdims=True)

    @pl.when(ci == pl.num_programs(1) - 1)
    def _finalize():
        per_sample = m_sc[...] + jnp.log(l_sc[...]) - pick_sc[...]   # (TB, 1)
        if mask_rows:
            row = bi * tb + jax.lax.broadcasted_iota(jnp.int32, (tb, 1), 0)
            per_sample = jnp.where(row < total_b, per_sample, 0.0)
        # lane-dense partial-sum output keeps the batch grid axis parallel-safe
        out_ref[...] = jnp.full(out_ref.shape, jnp.sum(per_sample),
                                dtype=jnp.float32)


def _round_up(x, m):
    return ((x + m - 1) // m) * m


def _pick_tiles(batch, num_classes, itemsize):
    """Choose (TB, TC, vmem_limit) from the actual VMEM footprint."""
    try:
        info = pltpu.get_tpu_info()
        vmem_cap = int(getattr(info, "vmem_capacity_bytes", 0)) or 64 * 1024 * 1024
    except Exception:
        vmem_cap = 64 * 1024 * 1024            # v7x physical size: safe everywhere

    # Scoped-VMEM limit we request from Mosaic: 96 MiB on v5e/v6e (128 MiB
    # physical), 48 MiB on v7x (64 MiB physical).
    vmem_limit = min((vmem_cap * 3) // 4, 96 * 1024 * 1024)
    usable = vmem_limit - 2 * 1024 * 1024      # output buffers / misc slack

    sub = max(8, 32 // max(1, itemsize))       # packed sublane multiple per dtype

    def rows_for(tc_lanes):
        # Per-row VMEM bytes, lane padding included:
        #   2x double-buffered native-dtype logits block
        #   2x double-buffered (TB,1) int32 labels block, padded to 128 lanes
        #   4x f32 working tiles (cast / masked / exp / pick-select), conservative
        #   3x (TB,1) f32 scratch accumulators, padded to 128 lanes
        per_row = (2 * tc_lanes * itemsize
                   + 2 * _LANE * 4
                   + 4 * tc_lanes * 4
                   + 3 * _LANE * 4)
        return max(1, usable // per_row)

    tcp_full = _round_up(num_classes, _LANE)
    tb = rows_for(tcp_full)
    if tcp_full <= 2048 or tb >= 256:
        tc = num_classes                        # single full-extent class tile
    else:
        tc = 2048                               # tile the class axis (online LSE)
        tb = rows_for(tc)

    # Keep >=2 batch tiles whenever possible: lets the "parallel" axis shard
    # across both TensorCores on v7x; costs one ~0.35us grid step elsewhere.
    if batch >= 2 * sub:
        tb = min(tb, _round_up(pl.cdiv(batch, 2), sub))

    if tb >= batch:
        tb = batch                              # single full-extent row tile
    else:
        tb = max(sub, (tb // sub) * sub)        # multiple of the packed sublanes

    return tb, tc, int(vmem_limit)


def classification_loss(predict, gt, weight=None):
    """Equivalent of ClassificationLoss.forward on the use_cuda=True path:
    nn.CrossEntropyLoss() with mean reduction (per-class `weight` unused there)."""
    # TODO(synk): per-class `weight` rescaling (only used on the use_cuda=False
    # branch of the reference) and CrossEntropyLoss's default ignore_index=-100
    # are not implemented; labels are assumed to lie in [0, num_classes).
    # TODO(synk): forward pass only (no custom_vjp for training gradients).
    b, c = predict.shape
    gt2d = jnp.reshape(gt, (b, 1)).astype(jnp.int32)

    itemsize = jnp.dtype(predict.dtype).itemsize
    tb, tc, vmem_limit = _pick_tiles(b, c, itemsize)
    nb = pl.cdiv(b, tb)
    nc = pl.cdiv(c, tc)

    kernel = functools.partial(
        _ce_kernel, total_b=b, total_c=c,
        mask_rows=(b % tb) != 0, mask_cols=(c % tc) != 0)

    partials = pl.pallas_call(
        kernel,
        out_shape=jax.ShapeDtypeStruct((nb, _LANE), jnp.float32),
        grid_spec=pltpu.PrefetchScalarGridSpec(
            num_scalar_prefetch=0,
            grid=(nb, nc),
            in_specs=[
                pl.BlockSpec((tb, tc), lambda i, k: (i, k)),   # logits, native dtype
                pl.BlockSpec((tb, 1), lambda i, k: (i, 0)),    # labels
            ],
            out_specs=pl.BlockSpec((1, _LANE), lambda i, k: (i, 0)),
            scratch_shapes=[pltpu.VMEM((tb, 1), jnp.float32)] * 3,  # m / l / picked
        ),
        compiler_params=pltpu.CompilerParams(
            dimension_semantics=("parallel", "arbitrary"),
            vmem_limit_bytes=vmem_limit,
        ),
    )(predict, gt2d)

    # tiny final mean in plain JAX; 1/B folds to a compile-time constant multiply
    return jnp.sum(partials[:, 0]) * (1.0 / b)


if __name__ == "__main__":
    key = jax.random.PRNGKey(0)
    k_pred, k_gt = jax.random.split(key)

    B, C = 2, 4                       # batch size x number of classes
    predict = jax.random.normal(k_pred, (B, C), dtype=jnp.float32)
    gt = jax.random.randint(k_gt, (B, 1), 0, C, dtype=jnp.int32)

    loss = classification_loss(predict, gt)
    jax.block_until_ready(loss)

    # sanity check against plain-JAX cross entropy
    logp = jax.nn.log_softmax(predict, axis=-1)
    ref = -jnp.mean(jnp.take_along_axis(logp, gt.reshape(B, 1), axis=-1))
    assert jnp.allclose(loss, ref, atol=1e-5), (loss, ref)

    print("KERNEL_OK")
</pallas_src>

<mosaic_0001>
module attributes {stable_mosaic.version = 11 : i64} {
  func.func @_ce_kernel(%arg0: i32, %arg1: i32, %arg2: memref<2x4xf32, #tpu.memory_space<vmem>>, %arg3: memref<2x1xi32, #tpu.memory_space<vmem>>, %arg4: memref<1x128xf32, #tpu.memory_space<vmem>>, %arg5: memref<2x1xf32, #tpu.memory_space<vmem>>, %arg6: memref<2x1xf32, #tpu.memory_space<vmem>>, %arg7: memref<2x1xf32, #tpu.memory_space<vmem>>) attributes {dimension_semantics = [#tpu.dimension_semantics<parallel>, #tpu.dimension_semantics<arbitrary>], iteration_bounds = array<i64: 1, 1>, scalar_prefetch = 0 : i64, scratch_operands = 3 : i64, tpu.core_type = #tpu.core_type<tc>, window_params = [{transform_indices = @transform_0, window_bounds = array<i64: 2, 4>}, {transform_indices = @transform_1, window_bounds = array<i64: 2, 1>}, {transform_indices = @transform_2, window_bounds = array<i64: 1, 128>}]} {
    %c0_i32 = arith.constant 0 : i32
    %0 = arith.cmpi eq, %arg1, %c0_i32 : i32
    %1 = arith.extui %0 : i1 to i32
    %c0_i32_0 = arith.constant 0 : i32
    %2 = arith.cmpi ne, %1, %c0_i32_0 : i32
    scf.if %2 {
      %cst_21 = arith.constant 0xFF800000 : f32
      %38 = vector.broadcast %cst_21 : f32 to vector<2x1xf32>
      %c0_22 = arith.constant 0 : index
      %c0_23 = arith.constant 0 : index
      %39 = vector.load %arg5[%c0_22, %c0_23] : memref<2x1xf32, #tpu.memory_space<vmem>>, vector<2x1xf32>
      tpu.vector_store %arg5[%c0_22, %c0_23], %38 {strides = array<i32>} : memref<2x1xf32, #tpu.memory_space<vmem>>, vector<2x1xf32>,
      %cst_24 = arith.constant 0.000000e+00 : f32
      %40 = vector.broadcast %cst_24 : f32 to vector<2x1xf32>
      %c0_25 = arith.constant 0 : index
      %c0_26 = arith.constant 0 : index
      %41 = vector.load %arg6[%c0_25, %c0_26] : memref<2x1xf32, #tpu.memory_space<vmem>>, vector<2x1xf32>
      tpu.vector_store %arg6[%c0_25, %c0_26], %40 {strides = array<i32>} : memref<2x1xf32, #tpu.memory_space<vmem>>, vector<2x1xf32>,
      %cst_27 = arith.constant 0.000000e+00 : f32
      %42 = vector.broadcast %cst_27 : f32 to vector<2x1xf32>
      %c0_28 = arith.constant 0 : index
      %c0_29 = arith.constant 0 : index
      %43 = vector.load %arg7[%c0_28, %c0_29] : memref<2x1xf32, #tpu.memory_space<vmem>>, vector<2x1xf32>
      tpu.vector_store %arg7[%c0_28, %c0_29], %42 {strides = array<i32>} : memref<2x1xf32, #tpu.memory_space<vmem>>, vector<2x1xf32>,
    } else {
    }
    %c0 = arith.constant 0 : index
    %c0_1 = arith.constant 0 : index
    %3 = vector.load %arg2[%c0, %c0_1] : memref<2x4xf32, #tpu.memory_space<vmem>>, vector<2x4xf32>
    %c0_2 = arith.constant 0 : index
    %c0_3 = arith.constant 0 : index
    %4 = vector.load %arg3[%c0_2, %c0_3] : memref<2x1xi32, #tpu.memory_space<vmem>>, vector<2x1xi32>
    %c4_i32 = arith.constant 4 : i32
    %5 = arith.muli %arg1, %c4_i32 : i32
    %6 = tpu.iota {dimensions = array<i32: 1>} : vector<1x4xi32>
    %7 = vector.broadcast %5 : i32 to vector<1x4xi32>
    %8 = arith.addi %7, %6 : vector<1x4xi32>
    %c0_4 = arith.constant 0 : index
    %c0_5 = arith.constant 0 : index
    %9 = vector.load %arg5[%c0_4, %c0_5] : memref<2x1xf32, #tpu.memory_space<vmem>>, vector<2x1xf32>
    %cst = arith.constant dense<0xFF800000> : vector<2xf32>
    %10 = vector.multi_reduction <maximumf>, %3, %cst [1] : vector<2x4xf32> to vector<2xf32>
    %11 = vector.shape_cast %10 : vector<2xf32> to vector<2x1xf32>
    %12 = arith.maximumf %9, %11 : vector<2x1xf32>
    %13 = arith.subf %9, %12 : vector<2x1xf32>
    %14 = math.exp %13 : vector<2x1xf32>
    %c0_6 = arith.constant 0 : index
    %c0_7 = arith.constant 0 : index
    %15 = vector.load %arg6[%c0_6, %c0_7] : memref<2x1xf32, #tpu.memory_space<vmem>>, vector<2x1xf32>
    %16 = arith.mulf %14, %15 : vector<2x1xf32>
    %17 = vector.broadcast %12 : vector<2x1xf32> to vector<2x4xf32>
    %18 = arith.subf %3, %17 : vector<2x4xf32>
    %19 = math.exp %18 : vector<2x4xf32>
    %cst_8 = arith.constant dense<0.000000e+00> : vector<2xf32>
    %20 = vector.multi_reduction <add>, %19, %cst_8 [1] : vector<2x4xf32> to vector<2xf32>
    %21 = vector.shape_cast %20 : vector<2xf32> to vector<2x1xf32>
    %22 = arith.addf %16, %21 : vector<2x1xf32>
    %c0_9 = arith.constant 0 : index
    %c0_10 = arith.constant 0 : index
    %23 = vector.load %arg6[%c0_9, %c0_10] : memref<2x1xf32, #tpu.memory_space<vmem>>, vector<2x1xf32>
    tpu.vector_store %arg6[%c0_9, %c0_10], %22 {strides = array<i32>} : memref<2x1xf32, #tpu.memory_space<vmem>>, vector<2x1xf32>,
    %c0_11 = arith.constant 0 : index
    %c0_12 = arith.constant 0 : index
    %24 = vector.load %arg5[%c0_11, %c0_12] : memref<2x1xf32, #tpu.memory_space<vmem>>, vector<2x1xf32>
    tpu.vector_store %arg5[%c0_11, %c0_12], %12 {strides = array<i32>} : memref<2x1xf32, #tpu.memory_space<vmem>>, vector<2x1xf32>,
    %c0_13 = arith.constant 0 : index
    %c0_14 = arith.constant 0 : index
    %25 = vector.load %arg7[%c0_13, %c0_14] : memref<2x1xf32, #tpu.memory_space<vmem>>, vector<2x1xf32>
    %26 = vector.broadcast %8 : vector<1x4xi32> to vector<2x4xi32>
    %27 = vector.broadcast %4 : vector<2x1xi32> to vector<2x4xi32>
    %28 = arith.cmpi eq, %26, %27 : vector<2x4xi32>
    %cst_15 = arith.constant 0.000000e+00 : f32
    %29 = vector.broadcast %cst_15 : f32 to vector<2x4xf32>
    %30 = arith.select %28, %3, %29 : vector<2x4xi1>, vector<2x4xf32>
    %cst_16 = arith.constant dense<0.000000e+00> : vector<2xf32>
    %31 = vector.multi_reduction <add>, %30, %cst_16 [1] : vector<2x4xf32> to vector<2xf32>
    %32 = vector.shape_cast %31 : vector<2xf32> to vector<2x1xf32>
    %33 = arith.addf %25, %32 : vector<2x1xf32>
    %c0_17 = arith.constant 0 : index
    %c0_18 = arith.constant 0 : index
    %34 = vector.load %arg7[%c0_17, %c0_18] : memref<2x1xf32, #tpu.memory_space<vmem>>, vector<2x1xf32>
    tpu.vector_store %arg7[%c0_17, %c0_18], %33 {strides = array<i32>} : memref<2x1xf32, #tpu.memory_space<vmem>>, vector<2x1xf32>,
    %c0_i32_19 = arith.constant 0 : i32
    %35 = arith.cmpi eq, %arg1, %c0_i32_19 : i32
    %36 = arith.extui %35 : i1 to i32
    %c0_i32_20 = arith.constant 0 : i32
    %37 = arith.cmpi ne, %36, %c0_i32_20 : i32
    scf.if %37 {
      %c0_21 = arith.constant 0 : index
      %c0_22 = arith.constant 0 : index
      %38 = vector.load %arg5[%c0_21, %c0_22] : memref<2x1xf32, #tpu.memory_space<vmem>>, vector<2x1xf32>
      %c0_23 = arith.constant 0 : index
      %c0_24 = arith.constant 0 : index
      %39 = vector.load %arg6[%c0_23, %c0_24] : memref<2x1xf32, #tpu.memory_space<vmem>>, vector<2x1xf32>
      %40 = math.log %39 : vector<2x1xf32>
      %41 = arith.addf %38, %40 : vector<2x1xf32>
      %c0_25 = arith.constant 0 : index
      %c0_26 = arith.constant 0 : index
      %42 = vector.load %arg7[%c0_25, %c0_26] : memref<2x1xf32, #tpu.memory_space<vmem>>, vector<2x1xf32>
      %43 = arith.subf %41, %42 : vector<2x1xf32>
      %44 = vector.shape_cast %43 : vector<2x1xf32> to vector<1x2x1xf32>
      %cst_27 = arith.constant dense<0.000000e+00> : vector<1xf32>
      %45 = vector.multi_reduction <add>, %44, %cst_27 [1, 2] : vector<1x2x1xf32> to vector<1xf32>
      %46 = vector.shape_cast %45 : vector<1xf32> to vector<1x1x1xf32>
      %47 = vector.extract %46[0, 0, 0] : f32 from vector<1x1x1xf32>
      %48 = vector.broadcast %47 : f32 to vector<1x128xf32>
      %c0_28 = arith.constant 0 : index
      %c0_29 = arith.constant 0 : index
      %49 = vector.load %arg4[%c0_28, %c0_29] : memref<1x128xf32, #tpu.memory_space<vmem>>, vector<1x128xf32>
      tpu.vector_store %arg4[%c0_28, %c0_29], %48 {strides = array<i32>} : memref<1x128xf32, #tpu.memory_space<vmem>>, vector<1x128xf32>,
    } else {
    }
    return
  }
  func.func @transform_0(%arg0: i32, %arg1: i32) -> (i32, i32) {
    %c0_i32 = arith.constant 0 : i32
    return %arg0, %arg1 : i32, i32
  }
  func.func @transform_1(%arg0: i32, %arg1: i32) -> (i32, i32) {
    %c0_i32 = arith.constant 0 : i32
    %c0_i32_0 = arith.constant 0 : i32
    return %arg0, %c0_i32 : i32, i32
  }
  func.func @transform_2(%arg0: i32, %arg1: i32) -> (i32, i32) {
    %c0_i32 = arith.constant 0 : i32
    %c0_i32_0 = arith.constant 0 : i32
    return %arg0, %c0_i32 : i32, i32
  }
}

</mosaic_0001>

<bundles_post_ra>
// kernel: tpu_custom_call.1
= control target key start
LH: loop header
LB: loop body
LE: loop exit
PB: predicated region body
PF: predicated region fallthrough
CT: control target
= control target key end

     0   :  { %vm28_vm0 = vcmask 25600   ;;  %s185_s0 = inlined_call_operand.vmem [shape: f32[2,4], index: 0, kind: input, shape index: {}]   ;;  %s186_s1 = inlined_call_operand.vmem [shape: s32[2,1], index: 1, kind: input, shape index: {}]   ;;  %s187_s2 = inlined_call_operand.hbm [shape: f32[1,128], index: 2, kind: output, shape index: {}]  }
   0x1   :  { %v20_v0 = vld [vmem:[%s185_s0] sm:$0x3] }
   0x2   :  { %7 = vsyncpa [#allocation6], 0  ;;  %v29_v1 = vsel %vm28_vm0, %v20_v0, -inf  ;;  %vm16_vm1 = vcmask 1024   ;;  %v138_v2 = vmov -inf   ;;  %v139_v3 = vmov 0  }
   0x3   :  { %30 = vmax.xlane.f32.xlu0 %v29_v1  ;;  %17 = vst.msk [vmem:[#allocation2] sm:$0x3] %vm16_vm1, %v138_v2  ;;  %107 = vset.pattern.permute.xlu1 %v139_v3  ;;  %v21_v4 = vld [vmem:[%s186_s1] sm:$0x3]  ;;  %v140_v5 = vmov 0.0   ;;  %v23_v13 = vlaneseq  ;;  %s141_s0 = smov [#allocation5]  }
   0x4   :  { %106 = vset.pattern.permute.xlu0 %v139_v3  ;;  %55 = vperm.xlu1 %107, %v21_v4   ;;  %18 = vst.msk [vmem:[#allocation3] sm:$0x3] %vm16_vm1, %v140_v5  ;;  %19 = vst.msk [vmem:[#allocation4] sm:$0x3] %vm16_vm1, %v140_v5  ;;  %s92_s1 = sshll.u32 %s141_s0, 4  ;;  %s93_s1 = int_to_ptr.vmem [resolvable:$true] %s92_s1 }
   0x5   :  { %v24_v14 = vand.u32 127, %v23_v13  ;;  %s114_s14 = scalar_lea.vmem %s93_s1, 16  ;;  %s118_s15 = scalar_lea.vmem %s93_s1, 32 }
   0x6   :  { %p115_p0 = scmp.ne.s32.totalorder %s93_s1, %s114_s14  ;;  %p119_p1 = scmp.lt.s32.totalorder %s93_s1, %s93_s1 }
   0x7   :  { %p120_p2 = scmp.lt.s32.totalorder %s118_s15, %s114_s14 }
   0x9   :  { %p121_p3 = por %p120_p2, %p119_p1 }
   0xa   :  { %v27_v6 = vld [vmem:[#allocation2] sm:$0x3] }
   0xb   :  { %v36_v22 = vld [vmem:[#allocation3] sm:$0x3]  ;;  %v53_v26 = vld [vmem:[#allocation4] sm:$0x3]  ;;  %p122_p4 = pnand %p121_p3, %p115_p0 }
  0x83   :  { %v56_v15 = vpop.permute.xlu1 %55 }
  0x84   :  { %vm57_vm2 = vcmp.eq.s32.totalorder %v24_v14, %v56_v15 }
  0x85   :  { %v58_v17 = vsel %vm57_vm2, %v20_v0, 0.0 }
  0x86   :  { %v59_v19 = vsel %vm28_vm0, %v58_v17, 0.0 }
  0x90   :  { %v31_v7 = vpop.xlane.xlu0 %30 }
  0x91   :  { %v32_v8 = vmax.f32 %v27_v6, %v31_v7 }
  0x93   :  { %v33_v9 = vsub.f32 %v27_v6, %v32_v8  ;;  %52 = vst.msk [vmem:[#allocation2] sm:$0x3] %vm16_vm1, %v32_v8  ;;  %40 = vperm.xlu0 %106, %v32_v8  }
  0x95   :  { %v34_v20 = vmul.f32 1.442695, %v33_v9 }
  0x9a   :  { %v67_v32 = vld [vmem:[#allocation2] sm:$0x3] }
 0x112   :  { %v41_v10 = vpop.permute.xlu0 %40 }
 0x113   :  { %v43_v11 = vsub.f32 %v20_v0, %v41_v10 }
 0x115   :  { %v44_v12 = vmul.f32 1.442695, %v43_v11 }
 0x117   :  { %108 = vpow2.f32 %v44_v12 }
 0x118   :  { %110 = vpow2.f32 %v34_v20 }
 0x121   :  { %v109_v16 = vpop.eup %108 }
 0x122   :  { %v46_v18 = vsel %vm28_vm0, %v109_v16, 0.0  ;;  %v111_v21 = vpop.eup %110 }
 0x123   :  { %47 = vadd.xlane.f32.xlu1 %v46_v18  ;;  %v37_v23 = vmul.f32 %v111_v21, %v36_v22 }
 0x127   :  { %60 = vadd.xlane.f32.xlu1 %v59_v19 }
 0x1b0   :  { %v48_v24 = vpop.xlane.xlu1 %47 }
 0x1b1   :  { %v49_v25 = vadd.f32 %v48_v24, %v37_v23 }
 0x1b3   :  { %51 = vst.msk [vmem:[#allocation3] sm:$0x3] %vm16_vm1, %v49_v25 }
 0x1b4   :  { %v61_v27 = vpop.xlane.xlu1 %60 }
 0x1b5   :  { %v62_v28 = vadd.f32 %v61_v27, %v53_v26 }
 0x1b7   :  { %63 = vst.msk [vmem:[#allocation4] sm:$0x3] %vm16_vm1, %v62_v28 }
 0x1ba   :  { %v68_v29 = vld [vmem:[#allocation3] sm:$0x3] }
 0x1bb   :  { %112 = vlog2.f32 %v68_v29 }
 0x1be   :  { %v72_v33 = vld [vmem:[#allocation4] sm:$0x3] }
 0x1c5   :  { %v113_v30 = vpop.eup %112 }
 0x1c6   :  { %v70_v31 = vmul.f32 0.6931472, %v113_v30 }
 0x1c8   :  { %v71_v34 = vadd.f32 %v70_v31, %v67_v32 }
 0x1ca   :  { %v73_v35 = vsub.f32 %v71_v34, %v72_v33 }
 0x1cc   :  { %v74_v36 = vsel %vm16_vm1, %v73_v35, 0.0 }
 0x1cd   :  { %75 = vadd.xlane.f32.xlu1 %v74_v36 }
 0x25a   :  { %v76_v37 = vpop.xlane.xlu1 %75 }
 0x25b   :  { %v77_v38 = vrot.slane %v76_v37, 4 }
 0x25d   :  { %v78_v39 = vadd.f32 %v77_v38, %v76_v37 }
 0x25f   :  { %v79_v40 = vrot.slane %v78_v39, 2 }
 0x261   :  { %v80_v41 = vadd.f32 %v79_v40, %v78_v39 }
 0x263   :  { %v81_v42 = vrot.slane %v80_v41, 1 }
 0x265   :  { %v82_v43 = vadd.f32 %v81_v42, %v80_v41 }
 0x267   :  { %100 = vpush %v82_v43 }
 0x298   :  { %s101_s13 = spop %100 }
 0x299   :  { %v84_v44 = vstv %s101_s13 }
 0x29a   :  { %85 = vst [vmem:[#allocation5] sm:$0x1] %v84_v44 }
 0x29b   :  { %125 = shalt.err (!%p122_p4)
}
 0x29c   :  { %s126_s18 = scalar_lea.hbm %s187_s2, 16 }
 0x29d   :  { %p127_p5 = scmp.ne.s32.totalorder %s187_s2, %s126_s18  ;;  %p130_p6 = scmp.lt.u32.totalorder %s126_s18, %s187_s2 }
 0x29f   :  { %p132_p7 = pnand %p130_p6, %p127_p5 }
 0x2a1   :  { %135 = shalt.err (!%p132_p7)
}
 0x2a2   :  { %95 = dma.vmem_to_hbm [thread:$0]  %s93_s1, 16, %s187_s2, [#allocation6]  }
 0x2a3   :  { %136 = dma.done.wait [#allocation6], 16  }
 0x2a4   :  { %137 = vsyncadd [#allocation6], 4294967280 }
 0x2a5   :  { %99 = vsyncpa [#allocation6], 1 }

</bundles_post_ra>
